<compile_context>
chip_gen: v7x
topology: tpu7x:2x2x1
jax: 0.10.0
libtpu: 0.0.40
codegen_flags: <defaults>
</compile_context>

<pallas_src>
import functools

import jax
import jax.numpy as jnp
import numpy as np
from jax.experimental import pallas as pl
from jax.experimental.pallas import tpu as pltpu


# ---------------------------------------------------------------------------
# One-off self-check of pltpu.roll's shift direction (documented to match
# jnp.roll).  lru_cache => runs one tiny device kernel the first time it is
# called; call it once OUTSIDE any jax.jit trace (this script never jits the
# wrapper, and __main__ triggers it eagerly) so later calls just return the
# cached Python bool.
# ---------------------------------------------------------------------------
@functools.lru_cache(maxsize=None)
def _roll_is_jnp_like():
    def k(x_ref, o_ref):
        o_ref[...] = pltpu.roll(x_ref[...], 1, axis=1)

    x = jnp.arange(256, dtype=jnp.float32).reshape(1, 256)
    y = pl.pallas_call(k, out_shape=jax.ShapeDtypeStruct((1, 256), jnp.float32))(x)
    # jnp.roll semantics: element 255 wraps to position 0.
    return bool(np.asarray(y)[0, 0] == 255.0)


# ---------------------------------------------------------------------------
# Fused SPAResidualGroup kernel (one image per grid step).
# Activations are carried lane-dense as (C, H*W) f32 slabs in VMEM.
# ---------------------------------------------------------------------------
def _spa_group_kernel(x_ref, coord_ref, w_ref, b_ref, w7_ref, alpha_ref, o_ref,
                      *, C, H, W, K, num_rpabs, roll_like_jnp):
    HW = H * W
    f32 = jnp.float32

    x0 = x_ref[0].astype(f32)                       # (C, HW), group residual src
    hh = coord_ref[0:1, :]                          # (1, HW) row index (f32)
    ww = coord_ref[1:2, :]                          # (1, HW) col index (f32)

    def border_mask(sh, sw):
        # 1.0 where (h+sh, w+sw) is inside the image, 0.0 elsewhere.
        ok = ((hh >= -sh) & (hh <= (H - 1 - sh)) &
              (ww >= -sw) & (ww <= (W - 1 - sw)))
        return ok.astype(f32)                       # (1, HW), broadcasts over rows

    def shifted(arr, dh, dw):
        # tap[:, p] = arr[:, p + dh*W + dw], zero outside the image.
        if dh == 0 and dw == 0:
            return arr
        shift = dh * W + dw
        amt = (-shift) % HW if roll_like_jnp else shift % HW
        return pltpu.roll(arr, amt, axis=1) * border_mask(dh, dw)   # XLU + VPU

    def conv3x3(xin, idx):
        # Tap-fused im2col: one (C, 9C) x (9C, HW) MXU contraction, f32 accum.
        taps = [shifted(xin, dh, dw) for dh in (-1, 0, 1) for dw in (-1, 0, 1)]
        stack = jnp.concatenate(taps, axis=0)               # (9C, HW)
        acc = jnp.dot(w_ref[idx], stack, preferred_element_type=f32)
        return acc + b_ref[idx]                              # (C,1) lane-broadcast

    def spatial_attention_residual(x_res, y, r):
        # Channel stats via cross-sublane reductions (XLU), not per-row slices.
        avg = jnp.sum(y, axis=0, keepdims=True) * (1.0 / C)  # (1, HW)
        mx = jnp.max(y, axis=0, keepdims=True)               # (1, HW)
        stat = jnp.concatenate([avg, mx], axis=0)            # (2, HW)

        p = K // 2
        taps = [shifted(stat, dh - p, dw - p)
                for dh in range(K) for dw in range(K)]
        stack = jnp.concatenate(taps, axis=0)                # (2*K*K, HW)
        s = jnp.dot(w7_ref[r], stack, preferred_element_type=f32)   # (1, HW)

        sig = 0.5 * (1.0 + jnp.tanh(0.5 * s))                # exact sigmoid, EUP
        return x_res + y * sig                               # RPAB residual

    h = x0
    for r in range(num_rpabs):
        y = conv3x3(h, 2 * r)
        alpha = alpha_ref[r]                                  # single shared alpha
        y = jnp.where(y >= 0, y, alpha * y)                   # PReLU
        y = conv3x3(y, 2 * r + 1)                             # no activation
        h = spatial_attention_residual(h, y, r)
    t = conv3x3(h, 2 * num_rpabs)                             # group tail conv
    o_ref[0] = (x0 + t).astype(o_ref.dtype)                   # group residual


def spa_residual_group_forward(x, params, K):
    """x: (N, C, H, W) f32.  One fused pallas_call for the whole group."""
    N, C, H, W = x.shape
    HW = H * W
    num_rpabs = len(params["rpabs"])
    num_convs = 2 * num_rpabs + 1

    w_list, b_list, alphas, w7s = [], [], [], []
    for p in params["rpabs"]:
        w_list += [p["w1"], p["w2"]]
        b_list += [p["b1"], p["b2"]]
        alphas.append(jnp.asarray(p["alpha"], jnp.float32).reshape(()))
        w7s.append(p["w7"])
    w_list.append(params["wt"])
    b_list.append(params["bt"])

    # Lane-dense tap-fused weights:
    #   w_all[i, co, (kh*3 + kw)*C + ci] = w_i[co, ci, kh, kw]
    w_all = jnp.stack([jnp.transpose(w, (0, 2, 3, 1)).reshape(C, 9 * C)
                       for w in w_list]).astype(jnp.float32)
    b_all = jnp.stack(b_list).astype(jnp.float32).reshape(num_convs, C, 1)
    alpha_all = jnp.stack(alphas)                                   # (R,) -> SMEM
    #   w7_all[r, 0, (kh*K + kw)*2 + c] = w7_r[0, c, kh, kw]
    w7_all = jnp.stack([jnp.transpose(w7[0], (1, 2, 0)).reshape(1, 2 * K * K)
                        for w7 in w7s]).astype(jnp.float32)

    # Tiny (2, HW) row/col index map; in-kernel border masks are derived from it
    # (replaces 9 + K*K full-plane masks DMA'd from HBM).
    pos = np.arange(HW)
    coords = jnp.asarray(np.stack([pos // W, pos % W]).astype(np.float32))

    x_flat = x.reshape(N, C, HW)                   # lane-dense layout plumbing

    kernel = functools.partial(
        _spa_group_kernel, C=C, H=H, W=W, K=K, num_rpabs=num_rpabs,
        roll_like_jnp=_roll_is_jnp_like())

    flops = N * (num_convs * 2 * C * (9 * C) * HW          # fused 3x3 convs
                 + num_rpabs * 2 * (2 * K * K) * HW        # SA 7x7 convs
                 + num_rpabs * 8 * C * HW)                  # elementwise tail
    cost = pl.CostEstimate(
        flops=int(flops),
        transcendentals=int(N * num_rpabs * HW),
        bytes_accessed=int(4 * (2 * N * C * HW + coords.size + w_all.size
                                + b_all.size + w7_all.size)))

    out_flat = pl.pallas_call(
        kernel,
        out_shape=jax.ShapeDtypeStruct((N, C, HW), x.dtype),
        grid=(N,),
        in_specs=[
            pl.BlockSpec((1, C, HW), lambda n: (n, 0, 0)),
            pl.BlockSpec((2, HW), lambda n: (0, 0)),
            pl.BlockSpec((num_convs, C, 9 * C), lambda n: (0, 0, 0)),
            pl.BlockSpec((num_convs, C, 1), lambda n: (0, 0, 0)),
            pl.BlockSpec((num_rpabs, 1, 2 * K * K), lambda n: (0, 0, 0)),
            pl.BlockSpec(memory_space=pltpu.MemorySpace.SMEM),
        ],
        out_specs=pl.BlockSpec((1, C, HW), lambda n: (n, 0, 0)),
        compiler_params=pltpu.CompilerParams(
            dimension_semantics=("parallel",),              # megacore split
            vmem_limit_bytes=32 * 1024 * 1024),
        cost_estimate=cost,
    )(x_flat, coords, w_all, b_all, w7_all, alpha_all)

    return out_flat.reshape(N, C, H, W)


# ---------------------------------------------------------------------------
# Pure-JAX reference (for the correctness check).
# ---------------------------------------------------------------------------
def _conv2d_ref(x, w, b, pad):
    out = jax.lax.conv_general_dilated(
        x, w, window_strides=(1, 1), padding=[(pad, pad), (pad, pad)],
        dimension_numbers=("NCHW", "OIHW", "NCHW"),
        precision=jax.lax.Precision.HIGHEST)
    if b is not None:
        out = out + b[None, :, None, None]
    return out


def _rpab_ref(x, p, K):
    y = _conv2d_ref(x, p["w1"], p["b1"], 1)
    y = jnp.where(y >= 0, y, p["alpha"] * y)
    y = _conv2d_ref(y, p["w2"], p["b2"], 1)
    avg = jnp.mean(y, axis=1, keepdims=True)
    mx = jnp.max(y, axis=1, keepdims=True)
    s = _conv2d_ref(jnp.concatenate([avg, mx], axis=1), p["w7"], None, K // 2)
    return x + y * jax.nn.sigmoid(s)


def _group_ref(x, params, K):
    h = x
    for p in params["rpabs"]:
        h = _rpab_ref(h, p, K)
    h = _conv2d_ref(h, params["wt"], params["bt"], 1)
    return x + h


# ---------------------------------------------------------------------------
if __name__ == "__main__":
    N, C, H, W = 2, 4, 16, 16      # batch, n_feat, spatial
    K = 7                          # SpatialAttention kernel_size
    NUM_RPABS = 2                  # num_rpabs_per_group

    # Resolve the roll-direction probe eagerly (outside any jit trace).
    _roll_is_jnp_like()

    key = jax.random.PRNGKey(0)

    def nrm(k, shape, scale=0.1):
        return (scale * jax.random.normal(k, shape)).astype(jnp.float32)

    rpabs = []
    for _ in range(NUM_RPABS):
        key, k1, k2, k3, k4, k5 = jax.random.split(key, 6)
        rpabs.append({
            "w1": nrm(k1, (C, C, 3, 3)), "b1": nrm(k2, (C,)),
            "alpha": jnp.float32(0.25),                 # nn.PReLU() default init
            "w2": nrm(k3, (C, C, 3, 3)), "b2": nrm(k4, (C,)),
            "w7": nrm(k5, (1, 2, K, K)),
        })
    key, kt1, kt2, kx = jax.random.split(key, 4)
    params = {"rpabs": rpabs, "wt": nrm(kt1, (C, C, 3, 3)), "bt": nrm(kt2, (C,))}

    x = jax.random.normal(kx, (N, C, H, W), dtype=jnp.float32)

    out = jax.block_until_ready(spa_residual_group_forward(x, params, K))
    ref = jax.block_until_ready(_group_ref(x, params, K))

    assert out.shape == (N, C, H, W)
    # Tolerance note: the kernel accumulates the convs as tap-fused f32 matmuls
    # on the MXU while the reference uses XLA's conv path; their f32 pass
    # decomposition / accumulation order differ slightly.  Structural bugs
    # (wrong tap, mask or weight orientation) show up as O(0.1) deviations.
    assert np.allclose(np.asarray(out), np.asarray(ref), rtol=5e-3, atol=5e-3), (
        "Pallas output does not match reference")
    print("KERNEL_OK")
</pallas_src>

<mosaic_0001>
module attributes {stable_mosaic.version = 11 : i64} {
  func.func @k(%arg0: memref<1x256xf32, #tpu.memory_space<vmem>>, %arg1: memref<1x256xf32, #tpu.memory_space<vmem>>) attributes {dimension_semantics = [], scalar_prefetch = 0 : i64, scratch_operands = 0 : i64, tpu.core_type = #tpu.core_type<tc>} {
    %c0 = arith.constant 0 : index
    %c0_0 = arith.constant 0 : index
    %0 = vector.load %arg0[%c0, %c0_0] : memref<1x256xf32, #tpu.memory_space<vmem>>, vector<1x256xf32>
    %c1_i32 = arith.constant 1 : i32
    %1 = tpu.dynamic_rotate %0 by %c1_i32 dim 1 : vector<1x256xf32>, i32 -> vector<1x256xf32>
    %c0_1 = arith.constant 0 : index
    %c0_2 = arith.constant 0 : index
    %2 = vector.load %arg1[%c0_1, %c0_2] : memref<1x256xf32, #tpu.memory_space<vmem>>, vector<1x256xf32>
    tpu.vector_store %arg1[%c0_1, %c0_2], %1 {strides = array<i32>} : memref<1x256xf32, #tpu.memory_space<vmem>>, vector<1x256xf32>,
    return
  }
}

</mosaic_0001>

<bundles_post_ra>
// kernel: tpu_custom_call.1
= control target key start
LH: loop header
LB: loop body
LE: loop exit
PB: predicated region body
PF: predicated region fallthrough
CT: control target
= control target key end

     0   :  { %6 = vsyncpa [#allocation3], 0  ;;  %s170_s0 = inlined_call_operand.hbm [shape: f32[1,256], index: 0, kind: input, shape index: {}]   ;;  %s171_s1 = inlined_call_operand.hbm [shape: f32[1,256], index: 1, kind: output, shape index: {}]  }
   0x1   :  { %7 = vsyncpa [#allocation4], 0  ;;  %s132_s6 = smov [#allocation2]   ;;  %s84_s10 = scalar_lea.hbm %s170_s0, 32 }
   0x2   :  { %s14_s7 = sshll.u32 %s132_s6, 4  ;;  %p85_p0 = scmp.ne.s32.totalorder %s170_s0, %s84_s10  ;;  %s15_s7 = int_to_ptr.vmem [resolvable:$true] %s14_s7 }
   0x3   :  { %p88_p1 = scmp.lt.u32.totalorder %s84_s10, %s170_s0 }
   0x5   :  { %p90_p2 = pnand %p88_p1, %p85_p0 }
   0x7   :  { %93 = shalt.err (!%p90_p2)
}
   0x8   :  { %s94_s15 = scalar_lea.vmem %s15_s7, 32  ;;  %p99_p4 = scmp.lt.s32.totalorder %s15_s7, %s15_s7 }
   0x9   :  { %p95_p3 = scmp.ne.s32.totalorder %s15_s7, %s94_s15  ;;  %p100_p5 = scmp.lt.s32.totalorder %s94_s15, %s94_s15 }
   0xb   :  { %p101_p6 = por %p100_p5, %p99_p4 }
   0xd   :  { %p102_p7 = pnand %p101_p6, %p95_p3 }
   0xf   :  { %105 = shalt.err (!%p102_p7)
}
  0x10   :  { %17 = dma.hbm_to_vmem [thread:$0]  %s170_s0, 32, %s15_s7, [#allocation3]  }
  0x11   :  { %128 = dma.done.wait [#allocation3], 32  }
  0x12   :  { %129 = vsyncadd [#allocation3], 4294967264  ;;  %v23_v0 = vlaneseq  ;;  %v21_v4 = vld [vmem:[#allocation2] sm:$0x3]  ;;  %s133_s18 = smov 1   ;;  %s135_s0 = smov [#allocation5]  }
  0x13   :  { %v134_v7 = vmov 1966171168   ;;  %s71_s19 = sshll.u32 %s135_s0, 4  ;;  %s72_s19 = int_to_ptr.vmem [resolvable:$true] %s71_s19 }
  0x14   :  { %v24_v1 = vshrl.u32 %v23_v0, 7  ;;  %v46_v8 = vunpack.c.l.s4 %v134_v7  ;;  %v38_v9 = vand.u32 127, %v23_v0  ;;  %vm62_vm1 = vcmp.lt.s32.totalorder %v23_v0, 256  ;;  %s106_s20 = scalar_lea.vmem %s72_s19, 32  ;;  %p111_p9 = scmp.lt.s32.totalorder %s72_s19, %s72_s19 }
  0x15   :  { %p107_p8 = scmp.ne.s32.totalorder %s72_s19, %s106_s20  ;;  %p112_p10 = scmp.lt.s32.totalorder %s106_s20, %s106_s20 }
  0x16   :  { %v25_v2 = vsub.s32 0, %v24_v1  ;;  %v29_v3 = vsub.s32 1, %v24_v1  ;;  %v47_v11 = vunpack.c.0.s8 %v46_v8  ;;  %vm39_vm0 = vcmp.lt.s32.totalorder %v38_v9, 1 }
  0x17   :  { %p113_p11 = por %p112_p10, %p111_p9 }
  0x18   :  { %v26_v5 = vrot.slane %v21_v4, %v25_v2  ;;  %v30_v6 = vrot.slane %v21_v4, %v29_v3  ;;  %v50_v12 = vsub.s32 %v47_v11, %v24_v1 }
  0x19   :  { %p114_p12 = pnand %p113_p11, %p107_p8 }
  0x1a   :  { %33 = vrot.lane.b32.xlu0 %v26_v5, %s133_s18 }
  0x1e   :  { %35 = vrot.lane.b32.xlu0 %v30_v6, %s133_s18 }
  0x8c   :  { %v34_v10 = vpop.permute.xlu0 %33 }
  0x90   :  { %v36_v13 = vpop.permute.xlu0 %35 }
  0x91   :  { %v40_v14 = vsel %vm39_vm0, %v34_v10, %v36_v13  ;;  %v41_v15 = vsel %vm39_vm0, %v36_v13, %v34_v10 }
  0x92   :  { %v44_v16 = vcombine.low %v41_v15, %v40_v14 }
  0x94   :  { %v51_v17 = vrot.slane %v44_v16, %v50_v12 }
  0x96   :  { %v58_v18 = vrot.slane %v51_v17, %v50_v12 }
  0x98   :  { %64 = vst.msk [vmem:[#allocation5] sm:$0x3] %vm62_vm1, %v58_v18 }
  0x99   :  { %117 = shalt.err (!%p114_p12)
}
  0x9a   :  { %s118_s23 = scalar_lea.hbm %s171_s1, 32 }
  0x9b   :  { %p119_p13 = scmp.ne.s32.totalorder %s171_s1, %s118_s23  ;;  %p122_p0 = scmp.lt.u32.totalorder %s118_s23, %s171_s1 }
  0x9d   :  { %p124_p1 = pnand %p122_p0, %p119_p13 }
  0x9f   :  { %127 = shalt.err (!%p124_p1)
}
  0xa0   :  { %74 = dma.vmem_to_hbm [thread:$0]  %s72_s19, 32, %s171_s1, [#allocation4]  }
  0xa1   :  { %130 = dma.done.wait [#allocation4], 32  }
  0xa2   :  { %131 = vsyncadd [#allocation4], 4294967264 }
  0xa3   :  { %78 = vsyncpa [#allocation3], 1 }
  0xa4   :  { %79 = vsyncpa [#allocation4], 1 }

</bundles_post_ra>
